<compile_context>
chip_gen: v7x
topology: tpu7x:2x2x1
jax: 0.10.0
libtpu: 0.0.40
codegen_flags: <defaults>
</compile_context>

<pallas_src>
import functools
import math

import jax
import jax.numpy as jnp
from jax import lax
from jax.experimental import pallas as pl
from jax.experimental.pallas import tpu as pltpu

FEAT = 34          # keypoint feature dim (nn.Linear(34, 1024))
EMB = 1024         # embedding dim (only appears in the offline fold)
H = 32             # args.lstm_h_dim (small test value)
G4 = 4 * H         # 128 -> one full vreg lane width for the gate vector
NUM_CLASSES = 2    # nn.Linear(lstm_h_dim, 2)
NC_PAD = 128       # lane-dense padded classifier output width
SUBLANE = 8


def _pick_unroll(n_steps, cap=8):
    """Largest divisor of n_steps that is <= cap (avoids remainder handling)."""
    for u in (cap, 4, 2, 1):
        if u <= cap and n_steps % u == 0:
            return u
    return 1


def make_lstmkp_kernel(t_real, t_chunk, b_pad, n_chunks):
    """Kernel closure over static config (real T, chunk length, padded batch)."""
    tail = t_real - (n_chunks - 1) * t_chunk          # 1 .. t_chunk (static)

    def kernel(kp_ref, wx_ref, whh_ref, bx_ref, wc_ref, bc_ref, out_ref,
               gx_sc, h_sc, c_sc):
        chunk = pl.program_id(0)

        @pl.when(chunk == 0)
        def _():
            h_sc[...] = jnp.zeros_like(h_sc)
            c_sc[...] = jnp.zeros_like(c_sc)

        # Whole-chunk input-path gate projection on the MXU (K = 34 contracted
        # directly), staged into VMEM scratch laid out (t_chunk, B_pad, 4H) so
        # the recurrence indexes the leading dim only.
        gx = (jnp.dot(kp_ref[...], wx_ref[...],
                      preferred_element_type=jnp.float32) + bx_ref[...])
        gx_sc[...] = gx.reshape(t_chunk, b_pad, G4)

        whh = whh_ref[...]

        def run_recurrence(n_steps):
            def body(t, carry):
                h, c = carry
                g = jnp.dot(h, whh, preferred_element_type=jnp.float32) + gx_sc[t]
                sg = jax.nn.sigmoid(g[:, :3 * H])        # i | f | o (reordered)
                gg = jnp.tanh(g[:, 3 * H:])              # g
                c = sg[:, H:2 * H] * c + sg[:, :H] * gg
                h = sg[:, 2 * H:3 * H] * jnp.tanh(c)
                return h, c

            h, c = lax.fori_loop(0, n_steps, body, (h_sc[...], c_sc[...]),
                                 unroll=_pick_unroll(n_steps))
            h_sc[...] = h
            c_sc[...] = c

        if tail == t_chunk:
            # Every chunk (including the last) is full: one unmasked loop.
            run_recurrence(t_chunk)
        else:
            # Only the last chunk is short; its length is static, so no
            # per-timestep validity masking anywhere on the critical path.
            @pl.when(chunk < n_chunks - 1)
            def _():
                run_recurrence(t_chunk)

            @pl.when(chunk == n_chunks - 1)
            def _():
                run_recurrence(tail)

        # Classifier on the final hidden state, written lane-dense (padded N).
        @pl.when(chunk == n_chunks - 1)
        def _():
            out_ref[...] = (jnp.dot(h_sc[...], wc_ref[...],
                                    preferred_element_type=jnp.float32)
                            + bc_ref[...])

    return kernel


def init_params(key):
    """PyTorch-layout params (already transposed to right-multiply convention)."""
    ks = jax.random.split(key, 7)
    scale = 0.05
    we = scale * jax.random.normal(ks[0], (FEAT, EMB), jnp.float32)       # W_embed^T
    be = scale * jax.random.normal(ks[1], (1, EMB), jnp.float32)          # b_embed
    wih = scale * jax.random.normal(ks[2], (EMB, 4 * H), jnp.float32)     # W_ih^T
    whh = scale * jax.random.normal(ks[3], (H, 4 * H), jnp.float32)       # W_hh^T
    b = scale * jax.random.normal(ks[4], (1, 4 * H), jnp.float32)         # b_ih + b_hh
    wc = scale * jax.random.normal(ks[5], (H, NUM_CLASSES), jnp.float32)  # W_cls^T
    bc = scale * jax.random.normal(ks[6], (1, NUM_CLASSES), jnp.float32)  # b_cls
    return (we, be, wih, whh, b, wc, bc)


def fold_params(params):
    """Offline (f32) weight folds: embedder->gates fold, gate reorder, padding."""
    we, be, wih, whh, b, wc, bc = params
    # Fold linear_embedder into the LSTM input projection.
    wx = jnp.dot(we, wih)                        # (34, 4H)
    bx = jnp.dot(be, wih) + b                    # (1, 4H)
    # Reorder gate columns (i, f, g, o) -> (i, f, o, g): sigmoid on one 3H slab.
    idx = jnp.concatenate([jnp.arange(0, 2 * H),
                           jnp.arange(3 * H, 4 * H),
                           jnp.arange(2 * H, 3 * H)])
    wx = wx[:, idx]
    whh_r = whh[:, idx]
    bx = bx[:, idx]
    # Pad classifier to a lane-dense output width.
    wc_p = jnp.pad(wc, ((0, 0), (0, NC_PAD - NUM_CLASSES)))
    bc_p = jnp.pad(bc, ((0, 0), (0, NC_PAD - NUM_CLASSES)))
    return wx, whh_r, bx, wc_p, bc_p


@functools.partial(jax.jit, static_argnames=("t_chunk", "compute_dtype"))
def lstmkp_forward(keypoints, params, t_chunk=128, compute_dtype=jnp.float32):
    """keypoints: (B, T, 34) float32 (same layout as the PyTorch module input)."""
    B, T, F = keypoints.shape
    assert F == FEAT
    wx, whh_r, bx, wc_p, bc_p = fold_params(params)

    b_pad = ((B + SUBLANE - 1) // SUBLANE) * SUBLANE
    t_chunk = max(1, min(int(t_chunk), T))
    # Sub-32-bit input dtypes pack along sublanes: keep rows a packed multiple.
    packing = 4 // jnp.dtype(compute_dtype).itemsize
    while (t_chunk * b_pad) % (SUBLANE * packing):
        t_chunk += 1
    n_chunks = int(pl.cdiv(T, t_chunk))
    rows = t_chunk * b_pad

    # Time-major rows, 34-wide (no 128-wide feature pad, no full-width f32
    # copy); batch zero-padded to a sublane multiple so in-kernel reshapes are
    # layout-trivial.  Padded batch rows just carry the bias and are sliced off.
    kp = jnp.transpose(keypoints, (1, 0, 2)).astype(compute_dtype)   # (T, B, 34)
    kp = jnp.pad(kp, ((0, 0), (0, b_pad - B), (0, 0)))               # (T, B_pad, 34)
    kp = kp.reshape(T * b_pad, FEAT)

    wx = wx.astype(compute_dtype)        # bf16 option: halves kp/W_x MXU bytes

    kernel = make_lstmkp_kernel(T, t_chunk, b_pad, n_chunks)

    out = pl.pallas_call(
        kernel,
        out_shape=jax.ShapeDtypeStruct((b_pad, NC_PAD), jnp.float32),
        grid=(n_chunks,),
        in_specs=[
            pl.BlockSpec((rows, FEAT), lambda i: (i, 0)),   # kp chunk (pipelined)
            pl.BlockSpec((FEAT, G4), lambda i: (0, 0)),     # W_x (embedder folded)
            pl.BlockSpec((H, G4), lambda i: (0, 0)),        # W_hh
            pl.BlockSpec((1, G4), lambda i: (0, 0)),        # b_x
            pl.BlockSpec((H, NC_PAD), lambda i: (0, 0)),    # W_cls (lane-padded)
            pl.BlockSpec((1, NC_PAD), lambda i: (0, 0)),    # b_cls
        ],
        out_specs=pl.BlockSpec((b_pad, NC_PAD), lambda i: (0, 0)),
        scratch_shapes=[
            pltpu.VMEM((t_chunk, b_pad, G4), jnp.float32),  # staged gate proj
            pltpu.VMEM((b_pad, H), jnp.float32),            # h (carried)
            pltpu.VMEM((b_pad, H), jnp.float32),            # c (carried)
        ],
        compiler_params=pltpu.CompilerParams(
            dimension_semantics=("arbitrary",),   # sequential recurrence carry
            # Footprint is ~1 MiB even at t_chunk=128 (kp block 2x ~140 KiB,
            # gate scratch 512 KiB), far below every generation's scoped VMEM
            # limit including v7x, so no vmem_limit_bytes override is needed.
        ),
    )(kp, wx, whh_r, bx, wc_p, bc_p)
    return out[:B, :NUM_CLASSES]


@jax.jit
def lstmkp_reference(keypoints, params):
    """Pure-JAX reference reproducing the PyTorch forward semantics (unfolded)."""
    we, be, wih, whh, b, wc, bc = params
    kp = jnp.transpose(keypoints, (1, 0, 2)).astype(jnp.float32)   # (T, B, 34)
    x = jnp.dot(kp, we) + be                                       # (T, B, 1024)
    B = kp.shape[1]

    def step(carry, x_t):
        h, c = carry
        gates = x_t @ wih + h @ whh + b
        i = jax.nn.sigmoid(gates[:, 0 * H:1 * H])
        f = jax.nn.sigmoid(gates[:, 1 * H:2 * H])
        g = jnp.tanh(gates[:, 2 * H:3 * H])
        o = jax.nn.sigmoid(gates[:, 3 * H:4 * H])
        c = f * c + i * g
        h = o * jnp.tanh(c)
        return (h, c), None

    init = (jnp.zeros((B, H), jnp.float32), jnp.zeros((B, H), jnp.float32))
    (h_final, _), _ = lax.scan(step, init, x)
    return h_final @ wc + bc


if __name__ == "__main__":
    key = jax.random.PRNGKey(0)
    k1, k2, k3, k_par = jax.random.split(key, 4)
    params = init_params(k_par)

    # Case 1: batch=2, seq=8, chunk=4 -> 2 full chunks (carry + final classifier).
    kp1 = jax.random.normal(k1, (2, 8, FEAT), jnp.float32)
    y1 = jax.block_until_ready(lstmkp_forward(kp1, params, t_chunk=4))
    r1 = lstmkp_reference(kp1, params)
    assert y1.shape == (2, NUM_CLASSES)
    assert jnp.allclose(y1, r1, atol=1e-4, rtol=1e-4), (y1, r1)

    # Case 2: batch=3 (padded to 8 sublanes), seq=5, chunk=4 -> static short tail.
    kp2 = jax.random.normal(k2, (3, 5, FEAT), jnp.float32)
    y2 = jax.block_until_ready(lstmkp_forward(kp2, params, t_chunk=4))
    r2 = lstmkp_reference(kp2, params)
    assert y2.shape == (3, NUM_CLASSES)
    assert jnp.allclose(y2, r2, atol=1e-4, rtol=1e-4), (y2, r2)

    # Case 3: longer sequence with the default large chunk (amortized overhead,
    # 3 grid steps, 44-step tail).
    kp3 = jax.random.normal(k3, (4, 300, FEAT), jnp.float32)
    y3 = jax.block_until_ready(lstmkp_forward(kp3, params))          # t_chunk=128
    r3 = lstmkp_reference(kp3, params)
    assert y3.shape == (4, NUM_CLASSES)
    assert jnp.allclose(y3, r3, atol=1e-3, rtol=1e-3), (y3, r3)

    # Case 4: bf16 input-path operands (v6e/v7x MXU rate, half kp DMA bytes);
    # recurrence and accumulation stay f32, so only a loose check vs. the f32 ref.
    y4 = jax.block_until_ready(
        lstmkp_forward(kp3, params, compute_dtype=jnp.bfloat16))
    assert y4.shape == (4, NUM_CLASSES)
    assert bool(jnp.all(jnp.isfinite(y4)))
    assert jnp.allclose(y4, r3, atol=5e-2, rtol=5e-2), (y4, r3)

    print("KERNEL_OK")
</pallas_src>

<mosaic_0001>
module attributes {stable_mosaic.version = 11 : i64} {
  func.func @kernel(%arg0: i32, %arg1: memref<32x34xf32, #tpu.memory_space<vmem>>, %arg2: memref<34x128xf32, #tpu.memory_space<vmem>>, %arg3: memref<32x128xf32, #tpu.memory_space<vmem>>, %arg4: memref<1x128xf32, #tpu.memory_space<vmem>>, %arg5: memref<32x128xf32, #tpu.memory_space<vmem>>, %arg6: memref<1x128xf32, #tpu.memory_space<vmem>>, %arg7: memref<8x128xf32, #tpu.memory_space<vmem>>, %arg8: memref<4x8x128xf32, #tpu.memory_space<vmem>>, %arg9: memref<8x32xf32, #tpu.memory_space<vmem>>, %arg10: memref<8x32xf32, #tpu.memory_space<vmem>>) attributes {dimension_semantics = [#tpu.dimension_semantics<arbitrary>], iteration_bounds = array<i64: 2>, scalar_prefetch = 0 : i64, scratch_operands = 3 : i64, tpu.core_type = #tpu.core_type<tc>, window_params = [{transform_indices = @transform_0, window_bounds = array<i64: 32, 34>}, {pipeline_mode = #tpu.pipeline_mode<synchronous>, transform_indices = @transform_1, window_bounds = array<i64: 34, 128>}, {pipeline_mode = #tpu.pipeline_mode<synchronous>, transform_indices = @transform_2, window_bounds = array<i64: 32, 128>}, {pipeline_mode = #tpu.pipeline_mode<synchronous>, transform_indices = @transform_3, window_bounds = array<i64: 1, 128>}, {pipeline_mode = #tpu.pipeline_mode<synchronous>, transform_indices = @transform_4, window_bounds = array<i64: 32, 128>}, {pipeline_mode = #tpu.pipeline_mode<synchronous>, transform_indices = @transform_5, window_bounds = array<i64: 1, 128>}, {pipeline_mode = #tpu.pipeline_mode<synchronous>, transform_indices = @transform_6, window_bounds = array<i64: 8, 128>}]} {
    %c0_i32 = arith.constant 0 : i32
    %0 = arith.cmpi eq, %arg0, %c0_i32 : i32
    %1 = arith.extui %0 : i1 to i32
    %c0_i32_0 = arith.constant 0 : i32
    %2 = arith.cmpi ne, %1, %c0_i32_0 : i32
    scf.if %2 {
      %cst_38 = arith.constant 0.000000e+00 : f32
      %103 = vector.broadcast %cst_38 : f32 to vector<8x32xf32>
      %c0_39 = arith.constant 0 : index
      %c0_40 = arith.constant 0 : index
      %104 = vector.load %arg9[%c0_39, %c0_40] : memref<8x32xf32, #tpu.memory_space<vmem>>, vector<8x32xf32>
      tpu.vector_store %arg9[%c0_39, %c0_40], %103 {strides = array<i32>} : memref<8x32xf32, #tpu.memory_space<vmem>>, vector<8x32xf32>,
      %cst_41 = arith.constant 0.000000e+00 : f32
      %105 = vector.broadcast %cst_41 : f32 to vector<8x32xf32>
      %c0_42 = arith.constant 0 : index
      %c0_43 = arith.constant 0 : index
      %106 = vector.load %arg10[%c0_42, %c0_43] : memref<8x32xf32, #tpu.memory_space<vmem>>, vector<8x32xf32>
      tpu.vector_store %arg10[%c0_42, %c0_43], %105 {strides = array<i32>} : memref<8x32xf32, #tpu.memory_space<vmem>>, vector<8x32xf32>,
    } else {
    }
    %c0 = arith.constant 0 : index
    %c0_1 = arith.constant 0 : index
    %3 = vector.load %arg1[%c0, %c0_1] : memref<32x34xf32, #tpu.memory_space<vmem>>, vector<32x34xf32>
    %c0_2 = arith.constant 0 : index
    %c0_3 = arith.constant 0 : index
    %4 = vector.load %arg2[%c0_2, %c0_3] : memref<34x128xf32, #tpu.memory_space<vmem>>, vector<34x128xf32>
    %cst = arith.constant dense<0.000000e+00> : vector<32x128xf32>
    %5 = tpu.matmul %3, %4, %cst {dimension_numbers = #tpu.dot_dimension_numbers<[1], [0], [0], [1], [0, 0, 1, 1], [], []>} : vector<32x34xf32>, vector<34x128xf32>, vector<32x128xf32> -> vector<32x128xf32>
    %c0_4 = arith.constant 0 : index
    %c0_5 = arith.constant 0 : index
    %6 = vector.load %arg4[%c0_4, %c0_5] : memref<1x128xf32, #tpu.memory_space<vmem>>, vector<1x128xf32>
    %7 = vector.broadcast %6 : vector<1x128xf32> to vector<32x128xf32>
    %8 = arith.addf %5, %7 : vector<32x128xf32>
    %9 = vector.shape_cast %8 : vector<32x128xf32> to vector<4x8x128xf32>
    %c0_6 = arith.constant 0 : index
    %c0_7 = arith.constant 0 : index
    %c0_8 = arith.constant 0 : index
    %10 = vector.load %arg8[%c0_6, %c0_7, %c0_8] : memref<4x8x128xf32, #tpu.memory_space<vmem>>, vector<4x8x128xf32>
    tpu.vector_store %arg8[%c0_6, %c0_7, %c0_8], %9 {strides = array<i32>} : memref<4x8x128xf32, #tpu.memory_space<vmem>>, vector<4x8x128xf32>,
    %c0_9 = arith.constant 0 : index
    %c0_10 = arith.constant 0 : index
    %11 = vector.load %arg3[%c0_9, %c0_10] : memref<32x128xf32, #tpu.memory_space<vmem>>, vector<32x128xf32>
    %c0_11 = arith.constant 0 : index
    %c0_12 = arith.constant 0 : index
    %12 = vector.load %arg9[%c0_11, %c0_12] : memref<8x32xf32, #tpu.memory_space<vmem>>, vector<8x32xf32>
    %c0_13 = arith.constant 0 : index
    %c0_14 = arith.constant 0 : index
    %13 = vector.load %arg10[%c0_13, %c0_14] : memref<8x32xf32, #tpu.memory_space<vmem>>, vector<8x32xf32>
    %c0_i32_15 = arith.constant 0 : i32
    %cst_16 = arith.constant dense<0.000000e+00> : vector<8x128xf32>
    %14 = tpu.matmul %12, %11, %cst_16 {dimension_numbers = #tpu.dot_dimension_numbers<[1], [0], [0], [1], [0, 0, 1, 1], [], []>} : vector<8x32xf32>, vector<32x128xf32>, vector<8x128xf32> -> vector<8x128xf32>
    %15 = arith.index_cast %c0_i32_15 : i32 to index
    %c0_17 = arith.constant 0 : index
    %c0_18 = arith.constant 0 : index
    %16 = vector.load %arg8[%15, %c0_17, %c0_18] : memref<4x8x128xf32, #tpu.memory_space<vmem>>, vector<1x8x128xf32>
    %17 = vector.shape_cast %16 : vector<1x8x128xf32> to vector<8x128xf32>
    %18 = arith.addf %14, %17 : vector<8x128xf32>
    %19 = vector.extract_strided_slice %18 {offsets = [0, 0], sizes = [8, 96], strides = [1, 1]} : vector<8x128xf32> to vector<8x96xf32>
    %20 = arith.negf %19 : vector<8x96xf32>
    %21 = math.exp %20 : vector<8x96xf32>
    %cst_19 = arith.constant 1.000000e+00 : f32
    %22 = vector.broadcast %cst_19 : f32 to vector<8x96xf32>
    %23 = arith.addf %22, %21 : vector<8x96xf32>
    %24 = arith.divf %22, %23 : vector<8x96xf32>
    %25 = vector.extract_strided_slice %18 {offsets = [0, 96], sizes = [8, 32], strides = [1, 1]} : vector<8x128xf32> to vector<8x32xf32>
    %26 = math.tanh %25 : vector<8x32xf32>
    %27 = vector.extract_strided_slice %24 {offsets = [0, 32], sizes = [8, 32], strides = [1, 1]} : vector<8x96xf32> to vector<8x32xf32>
    %28 = arith.mulf %27, %13 : vector<8x32xf32>
    %29 = vector.extract_strided_slice %24 {offsets = [0, 0], sizes = [8, 32], strides = [1, 1]} : vector<8x96xf32> to vector<8x32xf32>
    %30 = arith.mulf %29, %26 : vector<8x32xf32>
    %31 = arith.addf %28, %30 : vector<8x32xf32>
    %32 = vector.extract_strided_slice %24 {offsets = [0, 64], sizes = [8, 32], strides = [1, 1]} : vector<8x96xf32> to vector<8x32xf32>
    %33 = math.tanh %31 : vector<8x32xf32>
    %34 = arith.mulf %32, %33 : vector<8x32xf32>
    %c1_i32 = arith.constant 1 : i32
    %cst_20 = arith.constant dense<0.000000e+00> : vector<8x128xf32>
    %35 = tpu.matmul %34, %11, %cst_20 {dimension_numbers = #tpu.dot_dimension_numbers<[1], [0], [0], [1], [0, 0, 1, 1], [], []>} : vector<8x32xf32>, vector<32x128xf32>, vector<8x128xf32> -> vector<8x128xf32>
    %36 = arith.index_cast %c1_i32 : i32 to index
    %c0_21 = arith.constant 0 : index
    %c0_22 = arith.constant 0 : index
    %37 = vector.load %arg8[%36, %c0_21, %c0_22] : memref<4x8x128xf32, #tpu.memory_space<vmem>>, vector<1x8x128xf32>
    %38 = vector.shape_cast %37 : vector<1x8x128xf32> to vector<8x128xf32>
    %39 = arith.addf %35, %38 : vector<8x128xf32>
    %40 = vector.extract_strided_slice %39 {offsets = [0, 0], sizes = [8, 96], strides = [1, 1]} : vector<8x128xf32> to vector<8x96xf32>
    %41 = arith.negf %40 : vector<8x96xf32>
    %42 = math.exp %41 : vector<8x96xf32>
    %cst_23 = arith.constant 1.000000e+00 : f32
    %43 = vector.broadcast %cst_23 : f32 to vector<8x96xf32>
    %44 = arith.addf %43, %42 : vector<8x96xf32>
    %45 = arith.divf %43, %44 : vector<8x96xf32>
    %46 = vector.extract_strided_slice %39 {offsets = [0, 96], sizes = [8, 32], strides = [1, 1]} : vector<8x128xf32> to vector<8x32xf32>
    %47 = math.tanh %46 : vector<8x32xf32>
    %48 = vector.extract_strided_slice %45 {offsets = [0, 32], sizes = [8, 32], strides = [1, 1]} : vector<8x96xf32> to vector<8x32xf32>
    %49 = arith.mulf %48, %31 : vector<8x32xf32>
    %50 = vector.extract_strided_slice %45 {offsets = [0, 0], sizes = [8, 32], strides = [1, 1]} : vector<8x96xf32> to vector<8x32xf32>
    %51 = arith.mulf %50, %47 : vector<8x32xf32>
    %52 = arith.addf %49, %51 : vector<8x32xf32>
    %53 = vector.extract_strided_slice %45 {offsets = [0, 64], sizes = [8, 32], strides = [1, 1]} : vector<8x96xf32> to vector<8x32xf32>
    %54 = math.tanh %52 : vector<8x32xf32>
    %55 = arith.mulf %53, %54 : vector<8x32xf32>
    %c2_i32 = arith.constant 2 : i32
    %cst_24 = arith.constant dense<0.000000e+00> : vector<8x128xf32>
    %56 = tpu.matmul %55, %11, %cst_24 {dimension_numbers = #tpu.dot_dimension_numbers<[1], [0], [0], [1], [0, 0, 1, 1], [], []>} : vector<8x32xf32>, vector<32x128xf32>, vector<8x128xf32> -> vector<8x128xf32>
    %57 = arith.index_cast %c2_i32 : i32 to index
    %c0_25 = arith.constant 0 : index
    %c0_26 = arith.constant 0 : index
    %58 = vector.load %arg8[%57, %c0_25, %c0_26] : memref<4x8x128xf32, #tpu.memory_space<vmem>>, vector<1x8x128xf32>
    %59 = vector.shape_cast %58 : vector<1x8x128xf32> to vector<8x128xf32>
    %60 = arith.addf %56, %59 : vector<8x128xf32>
    %61 = vector.extract_strided_slice %60 {offsets = [0, 0], sizes = [8, 96], strides = [1, 1]} : vector<8x128xf32> to vector<8x96xf32>
    %62 = arith.negf %61 : vector<8x96xf32>
    %63 = math.exp %62 : vector<8x96xf32>
    %cst_27 = arith.constant 1.000000e+00 : f32
    %64 = vector.broadcast %cst_27 : f32 to vector<8x96xf32>
    %65 = arith.addf %64, %63 : vector<8x96xf32>
    %66 = arith.divf %64, %65 : vector<8x96xf32>
    %67 = vector.extract_strided_slice %60 {offsets = [0, 96], sizes = [8, 32], strides = [1, 1]} : vector<8x128xf32> to vector<8x32xf32>
    %68 = math.tanh %67 : vector<8x32xf32>
    %69 = vector.extract_strided_slice %66 {offsets = [0, 32], sizes = [8, 32], strides = [1, 1]} : vector<8x96xf32> to vector<8x32xf32>
    %70 = arith.mulf %69, %52 : vector<8x32xf32>
    %71 = vector.extract_strided_slice %66 {offsets = [0, 0], sizes = [8, 32], strides = [1, 1]} : vector<8x96xf32> to vector<8x32xf32>
    %72 = arith.mulf %71, %68 : vector<8x32xf32>
    %73 = arith.addf %70, %72 : vector<8x32xf32>
    %74 = vector.extract_strided_slice %66 {offsets = [0, 64], sizes = [8, 32], strides = [1, 1]} : vector<8x96xf32> to vector<8x32xf32>
    %75 = math.tanh %73 : vector<8x32xf32>
    %76 = arith.mulf %74, %75 : vector<8x32xf32>
    %c3_i32 = arith.constant 3 : i32
    %cst_28 = arith.constant dense<0.000000e+00> : vector<8x128xf32>
    %77 = tpu.matmul %76, %11, %cst_28 {dimension_numbers = #tpu.dot_dimension_numbers<[1], [0], [0], [1], [0, 0, 1, 1], [], []>} : vector<8x32xf32>, vector<32x128xf32>, vector<8x128xf32> -> vector<8x128xf32>
    %78 = arith.index_cast %c3_i32 : i32 to index
    %c0_29 = arith.constant 0 : index
    %c0_30 = arith.constant 0 : index
    %79 = vector.load %arg8[%78, %c0_29, %c0_30] : memref<4x8x128xf32, #tpu.memory_space<vmem>>, vector<1x8x128xf32>
    %80 = vector.shape_cast %79 : vector<1x8x128xf32> to vector<8x128xf32>
    %81 = arith.addf %77, %80 : vector<8x128xf32>
    %82 = vector.extract_strided_slice %81 {offsets = [0, 0], sizes = [8, 96], strides = [1, 1]} : vector<8x128xf32> to vector<8x96xf32>
    %83 = arith.negf %82 : vector<8x96xf32>
    %84 = math.exp %83 : vector<8x96xf32>
    %cst_31 = arith.constant 1.000000e+00 : f32
    %85 = vector.broadcast %cst_31 : f32 to vector<8x96xf32>
    %86 = arith.addf %85, %84 : vector<8x96xf32>
    %87 = arith.divf %85, %86 : vector<8x96xf32>
    %88 = vector.extract_strided_slice %81 {offsets = [0, 96], sizes = [8, 32], strides = [1, 1]} : vector<8x128xf32> to vector<8x32xf32>
    %89 = math.tanh %88 : vector<8x32xf32>
    %90 = vector.extract_strided_slice %87 {offsets = [0, 32], sizes = [8, 32], strides = [1, 1]} : vector<8x96xf32> to vector<8x32xf32>
    %91 = arith.mulf %90, %73 : vector<8x32xf32>
    %92 = vector.extract_strided_slice %87 {offsets = [0, 0], sizes = [8, 32], strides = [1, 1]} : vector<8x96xf32> to vector<8x32xf32>
    %93 = arith.mulf %92, %89 : vector<8x32xf32>
    %94 = arith.addf %91, %93 : vector<8x32xf32>
    %95 = vector.extract_strided_slice %87 {offsets = [0, 64], sizes = [8, 32], strides = [1, 1]} : vector<8x96xf32> to vector<8x32xf32>
    %96 = math.tanh %94 : vector<8x32xf32>
    %97 = arith.mulf %95, %96 : vector<8x32xf32>
    %c4_i32 = arith.constant 4 : i32
    %c0_32 = arith.constant 0 : index
    %c0_33 = arith.constant 0 : index
    %98 = vector.load %arg9[%c0_32, %c0_33] : memref<8x32xf32, #tpu.memory_space<vmem>>, vector<8x32xf32>
    tpu.vector_store %arg9[%c0_32, %c0_33], %97 {strides = array<i32>} : memref<8x32xf32, #tpu.memory_space<vmem>>, vector<8x32xf32>,
    %c0_34 = arith.constant 0 : index
    %c0_35 = arith.constant 0 : index
    %99 = vector.load %arg10[%c0_34, %c0_35] : memref<8x32xf32, #tpu.memory_space<vmem>>, vector<8x32xf32>
    tpu.vector_store %arg10[%c0_34, %c0_35], %94 {strides = array<i32>} : memref<8x32xf32, #tpu.memory_space<vmem>>, vector<8x32xf32>,
    %c1_i32_36 = arith.constant 1 : i32
    %100 = arith.cmpi eq, %arg0, %c1_i32_36 : i32
    %101 = arith.extui %100 : i1 to i32
    %c0_i32_37 = arith.constant 0 : i32
    %102 = arith.cmpi ne, %101, %c0_i32_37 : i32
    scf.if %102 {
      %c0_38 = arith.constant 0 : index
      %c0_39 = arith.constant 0 : index
      %103 = vector.load %arg9[%c0_38, %c0_39] : memref<8x32xf32, #tpu.memory_space<vmem>>, vector<8x32xf32>
      %c0_40 = arith.constant 0 : index
      %c0_41 = arith.constant 0 : index
      %104 = vector.load %arg5[%c0_40, %c0_41] : memref<32x128xf32, #tpu.memory_space<vmem>>, vector<32x128xf32>
      %cst_42 = arith.constant dense<0.000000e+00> : vector<8x128xf32>
      %105 = tpu.matmul %103, %104, %cst_42 {dimension_numbers = #tpu.dot_dimension_numbers<[1], [0], [0], [1], [0, 0, 1, 1], [], []>} : vector<8x32xf32>, vector<32x128xf32>, vector<8x128xf32> -> vector<8x128xf32>
      %c0_43 = arith.constant 0 : index
      %c0_44 = arith.constant 0 : index
      %106 = vector.load %arg6[%c0_43, %c0_44] : memref<1x128xf32, #tpu.memory_space<vmem>>, vector<1x128xf32>
      %107 = vector.broadcast %106 : vector<1x128xf32> to vector<8x128xf32>
      %108 = arith.addf %105, %107 : vector<8x128xf32>
      %c0_45 = arith.constant 0 : index
      %c0_46 = arith.constant 0 : index
      %109 = vector.load %arg7[%c0_45, %c0_46] : memref<8x128xf32, #tpu.memory_space<vmem>>, vector<8x128xf32>
      tpu.vector_store %arg7[%c0_45, %c0_46], %108 {strides = array<i32>} : memref<8x128xf32, #tpu.memory_space<vmem>>, vector<8x128xf32>,
    } else {
    }
    return
  }
  func.func @transform_0(%arg0: i32) -> (i32, i32) {
    %c0_i32 = arith.constant 0 : i32
    %c0_i32_0 = arith.constant 0 : i32
    return %arg0, %c0_i32 : i32, i32
  }
  func.func @transform_1(%arg0: i32) -> (i32, i32) {
    %c0_i32 = arith.constant 0 : i32
    %c0_i32_0 = arith.constant 0 : i32
    %c0_i32_1 = arith.constant 0 : i32
    return %c0_i32, %c0_i32_0 : i32, i32
  }
  func.func @transform_2(%arg0: i32) -> (i32, i32) {
    %c0_i32 = arith.constant 0 : i32
    %c0_i32_0 = arith.constant 0 : i32
    %c0_i32_1 = arith.constant 0 : i32
    return %c0_i32, %c0_i32_0 : i32, i32
  }
  func.func @transform_3(%arg0: i32) -> (i32, i32) {
    %c0_i32 = arith.constant 0 : i32
    %c0_i32_0 = arith.constant 0 : i32
    %c0_i32_1 = arith.constant 0 : i32
    return %c0_i32, %c0_i32_0 : i32, i32
  }
  func.func @transform_4(%arg0: i32) -> (i32, i32) {
    %c0_i32 = arith.constant 0 : i32
    %c0_i32_0 = arith.constant 0 : i32
    %c0_i32_1 = arith.constant 0 : i32
    return %c0_i32, %c0_i32_0 : i32, i32
  }
  func.func @transform_5(%arg0: i32) -> (i32, i32) {
    %c0_i32 = arith.constant 0 : i32
    %c0_i32_0 = arith.constant 0 : i32
    %c0_i32_1 = arith.constant 0 : i32
    return %c0_i32, %c0_i32_0 : i32, i32
  }
  func.func @transform_6(%arg0: i32) -> (i32, i32) {
    %c0_i32 = arith.constant 0 : i32
    %c0_i32_0 = arith.constant 0 : i32
    %c0_i32_1 = arith.constant 0 : i32
    return %c0_i32, %c0_i32_0 : i32, i32
  }
}

</mosaic_0001>

<bundles_post_ra>
// kernel: lstmkp_forward.1
= control target key start
LH: loop header
LB: loop body
LE: loop exit
PB: predicated region body
PF: predicated region fallthrough
CT: control target
= control target key end

     0   :  { %s1180_s21 = smov 0   ;;  %s1309_s0 = inlined_call_operand.vmem [shape: f32[64,34], index: 0, kind: input, shape index: {}]   ;;  %s1310_s1 = inlined_call_operand.vmem [shape: f32[34,128], index: 1, kind: input, shape index: {}]   ;;  %s1311_s2 = inlined_call_operand.vmem [shape: f32[32,128], index: 2, kind: input, shape index: {}]   ;;  %s1312_s3 = inlined_call_operand.vmem [shape: f32[1,128], index: 3, kind: input, shape index: {}]   ;;  %s1313_s4 = inlined_call_operand.vmem [shape: f32[32,128], index: 4, kind: input, shape index: {}]   ;;  %s1314_s5 = inlined_call_operand.vmem [shape: f32[1,128], index: 5, kind: input, shape index: {}]   ;;  %s1315_s6 = inlined_call_operand.vmem [shape: f32[8,128], index: 6, kind: output, shape index: {}]  }
   0x1 LB: > { %s1186_s22 = sadd.s32 4294967295, %s1133_s21   ;;  %p911_p0 = scmp.ge.s32.totalorder %s1133_s21, 1  ;;  %s1133_s21 = sphi %s1180_s21, %s16_s21  }
   0x2   : > { %p208_p1 = scmp.lt.s32.totalorder %s1133_s21, 3 }
   0x4   : > { %p209_p2 = pnand %p911_p0, %p208_p1 }
   0x5   : > { %s912_s23 = sshll.u32 (!%p209_p2), %s1186_s22, 2  ;;  %p914_p4 = scmp.ne.s32.totalorder (!%p209_p2), %s1186_s22, 0 }
   0x6   : > { %212 = sbr.rel (%p209_p2) target bundleno = 3067 (0xbfb), region = 44  ;;  %p234_p3 = scmp.lt.s32.totalorder (!%p209_p2), %s912_s23, 7 }
   0xd   : > { %s1317_s23 = smov (!%p234_p3, %s912_s23), 7  ;;  %242 = sbr.rel (%p914_p4) target bundleno = 20 (0x14), region = 48 }
   0xe   : > { %s913_s24 = sshll.u32 %s1317_s23, 3  ;;  %vm243_vm0 = vcmask (!%p914_p4), 261120   ;;  %v1135_v0 = vmov (!%p914_p4), 0.0  }
   0xf   : > { %s1194_s27 = scalar_lea.vmem %s1309_s0, %s913_s24  ;;  %244 = vst.msk [vmem:[#allocation3] sm:$0xff] (!%p914_p4), %vm243_vm0, %v1135_v0  ;;  %245 = vst.msk [vmem:[#allocation4] sm:$0xff] (!%p914_p4), %vm243_vm0, %v1135_v0 }
  0x14 PF: > { %v250_v1 = vld [vmem:[%s1310_s1] sm:$0xff]  ;;  %v251_v2 = vld [vmem:[%s1310_s1 + $0x8] sm:$0xff]  ;;  %v252_v3 = vld [vmem:[%s1310_s1 + $0x10] sm:$0xff]  ;;  %vm262_vm1 = vcmask 277504   ;;  %v1136_v6 = vmov 0.0|0.0   ;;  %vm1137_vm2 = vmmov 0  }
  0x15   : > { %v1039_v4 = vpack.c.bf16 %v251_v2, %v250_v1  ;;  %v253_v5 = vld [vmem:[%s1310_s1 + $0x18] sm:$0xff]  ;;  %1047 = vmatprep.subr.bf16.mxu1 %v1136_v6  ;;  %v368_v7 = vld [vmem:[%s1311_s2] sm:$0xff]  ;;  %v369_v8 = vld [vmem:[%s1311_s2 + $0x8] sm:$0xff]  ;;  %v1138_v13 = vmov 0.0   ;;  %vm275_vm3 = vcmask 1041408   ;;  %vm375_vm4 = vcmask 261120  }
  0x16   : > { %v1043_v9 = vpack.c.bf16 %v253_v5, %v252_v3  ;;  %v1216_v10 = vpack.c.bf16 %v369_v8, %v368_v7  ;;  %v246_v11 = vld [vmem:[%s1194_s27] sm:$0xff]  ;;  %v370_v12 = vld [vmem:[%s1311_s2 + $0x10] sm:$0xff]  ;;  %992 = vmatprep.mubr.msk.f32.mxu1 %vm1137_vm2, %v1138_v13  ;;  %v371_v14 = vld [vmem:[%s1311_s2 + $0x18] sm:$0xff]  ;;  %s1139_s26 = smov 32   ;;  %s1140_s28 = smov 64  }
  0x17   : > { %1040 = vmatprep.subr.bf16.mxu0 %v1039_v4  ;;  %978 = vmatprep.mubr.msk.f32.mxu0 %vm262_vm1, %v246_v11  ;;  %v1051_v15 = vpack.c.bf16 %v371_v14, %v370_v12  ;;  %v254_v16 = vld [vmem:[%s1310_s1 + $0x20] sm:$0x3]  ;;  %v247_v18 = vld [vmem:[%s1194_s27 + $0x8] sm:$0xff]  ;;  %v248_v56 = vld [vmem:[%s1194_s27 + $0x10] sm:$0xff]  ;;  %p929_p5 = scmp.ne.s32.totalorder %s1186_s22, 1 }
  0x18   : > { %1042 = vmatpush3.bf16.msra.mxu0 %v1039_v4  ;;  %1049 = vmatpush3.bf16.msra.mxu1 %v1216_v10  ;;  %v372_v17 = vld [vmem:[#allocation3] sm:$0xff]  ;;  %v373_v27 = vld [vmem:[#allocation4] sm:$0xff]  ;;  %v249_v57 = vld [vmem:[%s1194_s27 + $0x18] sm:$0xff]  ;;  %s1141_s27 = smov 96   ;;  %vm1143_vm5 = vmmov (!%p929_p5), 0  }
  0x19   : > { %1044 = vmatprep.subr.bf16.mxu0 %v1043_v9  ;;  %1050 = vmatprep.subr.bf16.mxu1 %v1136_v6  ;;  %v1248_v20 = vld [vmem:[%s1312_s3] ss:$0 sm:$0xff] }
  0x1c   : > { %1046 = vmatpush3.bf16.msra.mxu0 %v1043_v9  ;;  %1052 = vmatpush3.bf16.msra.mxu1 %v1051_v15 }
  0x1d   : > { %976 = vmatprep.subr.msk.mxu0 %vm275_vm3, %v254_v16  ;;  %1053 = vmatprep.subr.bf16.mxu1 %v1136_v6 }
  0x1f   : > { %993 = vmatmul.mubr.msk.f32.vlgmr.msra.gmra.mrb[0].mxu1 %vm375_vm4, %v372_v17 }
  0x20   : > { %977 = vmatpush3.msk.msra.mxu0 %vm275_vm3, %v254_v16  ;;  %1055 = vmatpush3.bf16.msra.mxu1 %v1216_v10 }
  0x21   : > { %979 = vmatmul.mubr.msk.f32.vlgmr.msra.gmra.mrb[0].mxu0 %vm262_vm1, %v247_v18  ;;  %1056 = vmatprep.subr.bf16.mxu1 %v1136_v6 }
  0x22   : > { %1003 = vmatprep.mubr.msk.f32.mxu1 %vm1137_vm2, %v1138_v13  ;;  %1059 = vmatprep.subr.bf16.mxu0 %v1136_v6 }
  0x23   : > { %1061 = vmatpush3.bf16.msra.mxu0 %v1216_v10  ;;  %981 = vmatprep.mubr.msk.f32.mxu0 %vm262_vm1, %v248_v56 }
  0x24   : > { %1058 = vmatpush3.bf16.msra.mxu1 %v1051_v15  ;;  %1062 = vmatprep.subr.bf16.mxu0 %v1136_v6 }
  0x25   : > { %1065 = vmatprep.subr.bf16.mxu1 %v1136_v6  ;;  %982 = vmatmul.mubr.msk.f32.gmra.mrb[2].mxu0 %vm262_vm1, %v249_v57 }
  0x26   : > { %1014 = vmatprep.mubr.msk.f32.mxu0 %vm1137_vm2, %v1138_v13 }
  0x27   : > { %1064 = vmatpush3.bf16.msra.mxu0 %v1051_v15 }
  0xf2   : > { %v445_v19 = vpop.f32.mrb[0].mxu1 }
  0xf3   : > { %v994_v21 = vpop.f32.mrb[1].mxu1 }
  0xf4   : > { %v980_v22 = vpop.f32.mrb[0].mxu0 }
  0xf5   : > { %v345_v23 = vpop.f32.mrb[1].mxu0  ;;  %v351_v42 = vadd.f32 %v980_v22, %v1248_v20 }
  0xf6   : > { %v346_v24 = vadd.f32 %v1248_v20, %v345_v23 }
  0xf8   : > { %v446_v25 = vadd.f32 %v445_v19, %v346_v24  ;;  %v983_v61 = vpop.f32.mrb[2].mxu0 }
  0xf9   : > { %v355_v62 = vpop.f32.mrb[3].mxu0  ;;  %v361_v18 = vadd.f32 %v983_v61, %v1248_v20 }
  0xfa   : > { %1095 = vtanh.f32 %v446_v25  ;;  %v922_v28 = vmul.f32 -1.442695, %v446_v25  ;;  %v356_v0 = vadd.f32 %v1248_v20, %v355_v62 }
  0xfc   : > { %1097 = vpow2.f32 %v922_v28 }
 0x104   : > { %v1096_v26 = vpop.eup %1095 }
 0x105   : > { %462 = vrot.lane.b32.xlu0 %v1096_v26, %s1139_s26 }
 0x106   : > { %v1098_v29 = vpop.eup %1097 }
 0x107   : > { %v452_v30 = vadd.f32 1.0, %v1098_v29 }
 0x109   : > { %457 = vrot.lane.b32.xlu0 %v373_v27, %s1139_s26  ;;  %1099 = vrcp.f32 %v452_v30 }
 0x113   : > { %v1100_v31 = vpop.eup %1099 }
 0x177   : > { %v463_v32 = vpop.permute.xlu0 %462 }
 0x178   : > { %v465_v33 = vmul.f32 %v1100_v31, %v463_v32 }
 0x17a   : > { %467 = vrot.lane.b32.xlu1 %v465_v33, %s1139_s26 }
 0x17b   : > { %v458_v34 = vpop.permute.xlu0 %457 }
 0x17c   : > { %v460_v35 = vmul.f32 %v1100_v31, %v458_v34 }
 0x1ec   : > { %v468_v36 = vpop.permute.xlu1 %467 }
 0x1ed   : > { %v470_v37 = vadd.f32 %v468_v36, %v460_v35 }
 0x1ef   : > { %1101 = vtanh.f32 %v470_v37 }
 0x1f9   : > { %v1102_v38 = vpop.eup %1101 }
 0x1fa   : > { %473 = vrot.lane.b32.xlu1 %v1102_v38, %s1139_s26  ;;  %v796_v38 = vld [vmem:[%s1313_s4 + $0x8] sm:$0xff] (!%p929_p5) }
 0x26c   : > { %v474_v39 = vpop.permute.xlu1 %473 }
 0x26d   : > { %v476_v40 = vmul.f32 %v1100_v31, %v474_v39  ;;  %v797_v39 = vld [vmem:[%s1313_s4 + $0x10] sm:$0xff] (!%p929_p5) }
 0x26f   : > { %480 = vrot.lane.b32.xlu0 %v476_v40, %s1140_s28  ;;  %v1142_v40 = vmov (!%p929_p5), 0.0|0.0  }
 0x270   : > { %1071 = vmatprep.subr.bf16.mxu0 (!%p929_p5), %v1142_v40 }
 0x2e1   : > { %v481_v41 = vpop.permute.xlu0 %480 }
 0x2e2   : > { %1004 = vmatmul.mubr.msk.f32.vlgmr.msra.gmra.mrb[2].mxu1 %vm375_vm4, %v481_v41 }
 0x2e3   : > { %1067 = vmatpush3.bf16.msra.mxu1 %v1216_v10  ;;  %1025 = vmatprep.mubr.msk.f32.mxu1 %vm1137_vm2, %v1138_v13 }
 0x2e4   : > { %1068 = vmatprep.subr.bf16.mxu1 %v1136_v6 }
 0x2e7   : > { %1070 = vmatpush3.bf16.msra.mxu1 %v1051_v15 }
 0x3b5   : > { %v550_v43 = vpop.f32.mrb[2].mxu1 }
 0x3b6   : > { %v551_v44 = vadd.f32 %v550_v43, %v351_v42  ;;  %v1005_v45 = vpop.f32.mrb[3].mxu1  ;;  %v798_v42 = vld [vmem:[%s1313_s4 + $0x18] sm:$0xff] (!%p929_p5)  ;;  %v1144_v43 = vmov (!%p929_p5), 0.0  }
 0x3b8   : > { %1103 = vtanh.f32 %v551_v44  ;;  %v924_v47 = vmul.f32 -1.442695, %v551_v44  ;;  %v1075_v44 = vpack.c.bf16 (!%p929_p5), %v798_v42, %v797_v39 }
 0x3ba   : > { %1105 = vpow2.f32 %v924_v47 }
 0x3c2   : > { %v1104_v46 = vpop.eup %1103 }
 0x3c3   : > { %563 = vrot.lane.b32.xlu1 %v1104_v46, %s1139_s26  ;;  %v930_v46 = vld [vmem:[%s1314_s5] ss:$0 sm:$0xff] (!%p929_p5) }
 0x3c4   : > { %v1106_v48 = vpop.eup %1105 }
 0x3c5   : > { %v557_v49 = vadd.f32 1.0, %v1106_v48 }
 0x3c7   : > { %1107 = vrcp.f32 %v557_v49 }
 0x3d1   : > { %v1108_v50 = vpop.eup %1107 }
 0x3d2   : > { %v561_v53 = vmul.f32 %v1108_v50, %v470_v37  ;;  %v795_v37 = vld [vmem:[%s1313_s4] sm:$0xff] (!%p929_p5) }
 0x3d3   : > { %v1072_v41 = vpack.c.bf16 (!%p929_p5), %v796_v38, %v795_v37 }
 0x435   : > { %v564_v51 = vpop.permute.xlu1 %563 }
 0x436   : > { %v566_v52 = vmul.f32 %v1108_v50, %v564_v51 }
 0x438   : > { %568 = vrot.lane.b32.xlu0 %v566_v52, %s1139_s26 }
 0x4aa   : > { %v569_v54 = vpop.permute.xlu0 %568 }
 0x4ab   : > { %v571_v55 = vadd.f32 %v569_v54, %v561_v53 }
 0x4ad   : > { %1109 = vtanh.f32 %v571_v55 }
 0x4b7   : > { %v1110_v58 = vpop.eup %1109 }
 0x4b8   : > { %574 = vrot.lane.b32.xlu1 %v1110_v58, %s1139_s26 }
 0x52a   : > { %v575_v59 = vpop.permute.xlu1 %574 }
 0x52b   : > { %v577_v60 = vmul.f32 %v1108_v50, %v575_v59 }
 0x52d   : > { %581 = vrot.lane.b32.xlu0 %v577_v60, %s1140_s28 }
 0x59f   : > { %v582_v63 = vpop.permute.xlu0 %581 }
 0x5a0   : > { %1015 = vmatmul.mubr.msk.f32.vlgmr.msra.gmra.mrb[4].mxu0 %vm375_vm4, %v582_v63 }
 0x5a1   : > { %1036 = vmatprep.mubr.msk.f32.mxu0 (!%p929_p5), %vm1143_vm5, %v1144_v43  ;;  %1073 = vmatpush3.bf16.msra.mxu0 (!%p929_p5), %v1072_v41 }
 0x5a2   : > { %1074 = vmatprep.subr.bf16.mxu0 (!%p929_p5), %v1142_v40 }
 0x5a5   : > { %1076 = vmatpush3.bf16.msra.mxu0 (!%p929_p5), %v1075_v44 }
 0x673   : > { %v651_v1 = vpop.f32.mrb[4].mxu0 }
 0x674   : > { %v652_v2 = vadd.f32 %v651_v1, %v356_v0  ;;  %v1016_v3 = vpop.f32.mrb[5].mxu0 }
 0x676   : > { %1111 = vtanh.f32 %v652_v2  ;;  %v926_v5 = vmul.f32 -1.442695, %v652_v2 }
 0x678   : > { %1113 = vpow2.f32 %v926_v5 }
 0x680   : > { %v1112_v4 = vpop.eup %1111 }
 0x681   : > { %664 = vrot.lane.b32.xlu1 %v1112_v4, %s1139_s26 }
 0x682   : > { %v1114_v6 = vpop.eup %1113 }
 0x683   : > { %v658_v7 = vadd.f32 1.0, %v1114_v6 }
 0x685   : > { %1115 = vrcp.f32 %v658_v7 }
 0x68f   : > { %v1116_v8 = vpop.eup %1115 }
 0x690   : > { %v662_v11 = vmul.f32 %v1116_v8, %v571_v55 }
 0x6f3   : > { %v665_v9 = vpop.permute.xlu1 %664 }
 0x6f4   : > { %v667_v10 = vmul.f32 %v1116_v8, %v665_v9 }
 0x6f6   : > { %669 = vrot.lane.b32.xlu0 %v667_v10, %s1139_s26 }
 0x768   : > { %v670_v12 = vpop.permute.xlu0 %669 }
 0x769   : > { %v672_v13 = vadd.f32 %v670_v12, %v662_v11 }
 0x76b   : > { %1117 = vtanh.f32 %v672_v13 }
 0x775   : > { %v1118_v14 = vpop.eup %1117 }
 0x776   : > { %675 = vrot.lane.b32.xlu1 %v1118_v14, %s1139_s26 }
 0x7e8   : > { %v676_v15 = vpop.permute.xlu1 %675 }
 0x7e9   : > { %v678_v16 = vmul.f32 %v1116_v8, %v676_v15 }
 0x7eb   : > { %682 = vrot.lane.b32.xlu0 %v678_v16, %s1140_s28 }
 0x85d   : > { %v683_v17 = vpop.permute.xlu0 %682 }
 0x85e   : > { %1026 = vmatmul.mubr.msk.f32.vlgmr.msra.gmra.mrb[4].mxu1 %vm375_vm4, %v683_v17 }
 0x931   : > { %v752_v19 = vpop.f32.mrb[4].mxu1 }
 0x932   : > { %v753_v21 = vadd.f32 %v752_v19, %v361_v18  ;;  %v1027_v22 = vpop.f32.mrb[5].mxu1 }
 0x934   : > { %1119 = vtanh.f32 %v753_v21  ;;  %v928_v24 = vmul.f32 -1.442695, %v753_v21 }
 0x936   : > { %1121 = vpow2.f32 %v928_v24 }
 0x93e   : > { %v1120_v23 = vpop.eup %1119 }
 0x93f   : > { %765 = vrot.lane.b32.xlu1 %v1120_v23, %s1139_s26 }
 0x940   : > { %v1122_v25 = vpop.eup %1121 }
 0x941   : > { %v759_v26 = vadd.f32 1.0, %v1122_v25 }
 0x943   : > { %1123 = vrcp.f32 %v759_v26 }
 0x94d   : > { %v1124_v27 = vpop.eup %1123 }
 0x94e   : > { %v763_v30 = vmul.f32 %v1124_v27, %v672_v13 }
 0x9b1   : > { %v766_v28 = vpop.permute.xlu1 %765 }
 0x9b2   : > { %v768_v29 = vmul.f32 %v1124_v27, %v766_v28 }
 0x9b4   : > { %770 = vrot.lane.b32.xlu0 %v768_v29, %s1139_s26 }
 0xa26   : > { %v771_v31 = vpop.permute.xlu0 %770 }
 0xa27   : > { %v773_v20 = vadd.f32 %v771_v31, %v763_v30 }
 0xa29   : > { %1125 = vtanh.f32 %v773_v20 }
 0xa33   : > { %v1126_v32 = vpop.eup %1125 }
 0xa34   : > { %776 = vrot.lane.b32.xlu1 %v1126_v32, %s1139_s26 }
 0xa38   : > { %786 = vrot.lane.b32.xlu1 %v773_v20, %s1141_s27 }
 0xaa6   : > { %v777_v33 = vpop.permute.xlu1 %776 }
 0xaa7   : > { %v779_v34 = vmul.f32 %v1124_v27, %v777_v33 }
 0xaa9   : > { %781 = vrot.lane.b32.xlu0 %v779_v34, %s1140_s28 }
 0xaaa   : > { %v787_v35 = vpop.permute.xlu1 %786 }
 0xaab   : > { %789 = vst.msk [vmem:[#allocation4] sm:$0xff] %vm375_vm4, %v787_v35 }
 0xb16   : > { %793 = sbr.rel (%p929_p5) target bundleno = 3067 (0xbfb), region = 52 }
 0xb1b   : > { %v782_v36 = vpop.permute.xlu0 %781 }
 0xb1c   : > { %784 = vst.msk [vmem:[#allocation3] sm:$0xff] %vm375_vm4, %v782_v36 }
 0xb23   : > { %v794_v45 = vld [vmem:[#allocation3] sm:$0xff] }
 0xb24   : > { %1037 = vmatmul.mubr.msk.f32.vlgmr.msra.gmra.mrb[0].mxu0 %vm375_vm4, %v794_v45 }
 0xbf7   : > { %v875_v47 = vpop.f32.mrb[0].mxu0 }
 0xbf8   : > { %v876_v48 = vadd.f32 %v930_v46, %v875_v47  ;;  %v1038_v49 = vpop.f32.mrb[1].mxu0 }
 0xbfa   : > { %879 = vst [vmem:[%s1315_s6] sm:$0xff] %v876_v48 }
 0xbfb PF: > { %s16_s21 = sadd.s32 1, %s1133_s21  }
 0xbfc   : > { %p13_p6 = scmp.ge.s32.totalorder %s16_s21, 4  }
 0xbfe   :  { %15 = sbr.rel (!%p13_p6) target bundleno = 1 (0x1), region = 81 }

</bundles_post_ra>
